<compile_context>
chip_gen: v7x
topology: tpu7x:2x2x1
jax: 0.10.0
libtpu: 0.0.40
codegen_flags: <defaults>
</compile_context>

<pallas_src>
import jax
import jax.numpy as jnp
from jax.experimental import pallas as pl
from jax.experimental.pallas import tpu as pltpu

_MIB = 1024 * 1024
_HL = 128  # halo-strip / head-fixup width: one native lane group


def _round_up(x, m):
    return (x + m - 1) // m * m


def _vmem_budget():
    """Per-chip VMEM limit (for CompilerParams) and tile-picking budget."""
    try:
        cap = int(pltpu.get_tpu_info().vmem_capacity_bytes)
    except Exception:
        cap = 0
    if cap <= 0:
        cap = 64 * _MIB  # conservative default (v7x per-TensorCore size)
    limit = max(min(cap - 16 * _MIB, 112 * _MIB), 24 * _MIB)
    return limit, int(limit * 0.7)


def _pick_tiles(B, C_in, C_inner, C_out, L, L_out, K, pad, itemsize, budget):
    """Choose (mode, Bt, TL_in, TL_out, n_b, n_l)."""
    w_bytes = (C_inner * (C_in + K + 2) + C_out * (C_inner + 1)) * itemsize

    def step_bytes(bt, tl_in, tl_out, halo):
        io = 2 * bt * (C_in * tl_in + C_out * tl_out) * itemsize   # double-buffered blocks
        sc = bt * C_inner * _HL * 4 if halo else 0                 # halo scratch
        tmp = 4 * C_inner * max(tl_in, tl_out) * 4                 # live h/acc/roll values
        return io + sc + tmp + 2 * w_bytes

    # ---- tiled-L path: "same length" config (pad == K-1), lane-aligned L, >= 2 tiles.
    if pad == K - 1 and 0 < pad < _HL and L % _HL == 0 and L >= 2 * _HL:
        divs = [tl for tl in range(_HL, min(L // 2, 4096) + 1, _HL) if L % tl == 0]
        if divs:
            tl = next((t for t in reversed(divs) if step_bytes(1, t, t, True) <= budget),
                      divs[0])
            return "tiled", 1, tl, tl, B, L // tl

    # ---- general single-L-tile path (short / irregular / pad != K-1): fold batch.
    L_pad = max(_round_up(max(L, L_out), _HL), _HL)
    Bt = 1
    for cand in range(min(B, 8), 0, -1):
        if B % cand == 0 and step_bytes(cand, L_pad, L_out, False) <= budget:
            Bt = cand
            break
    return "single", Bt, L_pad, L_out, B // Bt, 1


def _vpu_matvec(w_cols, rows, bias_f32):
    """sum_c w_cols[c] (C_to,1) * rows[c] (1,W) + bias -- unrolled VPU broadcast-FMA."""
    out = None
    for wc, rc in zip(w_cols, rows):
        term = wc * rc
        out = term if out is None else out + term
    return out + bias_f32


def _make_kernel(*, Bt, C_in, C_inner, C_out, K, pad, TL_in, TL_out, carry,
                 use_mxu_pre, use_mxu_post):
    if carry:
        assert Bt == 1 and pad == K - 1 and 0 < pad < _HL
        assert TL_in == TL_out and TL_in >= _HL and TL_in % _HL == 0

    def kernel(x_ref, w1_ref, b1_ref, wd_ref, bd_ref, w3_ref, b3_ref, o_ref, *scratch):
        j = pl.program_id(1)
        out_dtype = o_ref.dtype

        # --- hoisted, cast-once parameters (no per-tap casts / broadcasts) ---
        b1f = b1_ref[...].astype(jnp.float32)                       # (C_inner, 1)
        bdf = bd_ref[...].astype(jnp.float32)                       # (C_inner, 1)
        b3f = b3_ref[...].astype(jnp.float32)                       # (C_out, 1)
        wk_col = [wd_ref[:, k:k + 1].astype(jnp.float32) for k in range(K)]
        w1 = w1_ref[...] if use_mxu_pre else None
        w3 = w3_ref[...] if use_mxu_post else None
        w1_cols = (None if use_mxu_pre else
                   [w1_ref[:, c:c + 1].astype(jnp.float32) for c in range(C_in)])
        w3_cols = (None if use_mxu_post else
                   [w3_ref[:, c:c + 1].astype(jnp.float32) for c in range(C_inner)])

        def pre_pointwise(b):
            if use_mxu_pre:
                return jnp.dot(w1, x_ref[b].astype(w1.dtype),
                               preferred_element_type=jnp.float32) + b1f
            rows = [x_ref[b, c:c + 1, :].astype(jnp.float32) for c in range(C_in)]
            return _vpu_matvec(w1_cols, rows, b1f)

        def post_pointwise(acc):
            if use_mxu_post:
                # NOTE: intentionally downcasts the f32 accumulator to the weight dtype
                # so bf16 weights hit the bf16 MXU rate (documented precision tradeoff).
                return jnp.dot(w3, acc.astype(w3.dtype),
                               preferred_element_type=jnp.float32) + b3f
            rows = [acc[c:c + 1, :] for c in range(C_inner)]
            return _vpu_matvec(w3_cols, rows, b3f)

        if carry:
            halo_ref = scratch[0]                                   # (Bt, C_inner, 128) f32

            @pl.when(j == 0)
            def _zero_halo():     # F.pad's left zeros for the first L tile of each row
                halo_ref[...] = jnp.zeros_like(halo_ref)

            lane_head = jax.lax.broadcasted_iota(jnp.int32, (C_inner, _HL), 1)
        else:
            lane_full = jax.lax.broadcasted_iota(jnp.int32, (C_inner, TL_in), 1)

        for b in range(Bt):
            # ---- pre pointwise (1x1 conv); h stays in vregs ----
            h = pre_pointwise(b)                                    # (C_inner, TL_in) f32

            if carry:
                halo_prev = halo_ref[b]                             # previous tile's h tail
                acc = None
                acc_head = None
                for k in range(K):
                    s = pad - k                                     # right shift, in [0, K-1]
                    if s == 0:
                        rolled, tap_head = h, h[:, :_HL]
                    else:
                        rolled = pltpu.roll(h, shift=s, axis=1)
                        # rolled's first s lanes wrapped from *this* tile's tail; the
                        # correct values there are the *previous* tile's tail (the halo).
                        tap_head = jnp.where(lane_head >= s, rolled[:, :_HL],
                                             pltpu.roll(halo_prev, shift=s, axis=1))
                    term = rolled * wk_col[k]
                    term_h = tap_head * wk_col[k]
                    acc = term if acc is None else acc + term
                    acc_head = term_h if acc_head is None else acc_head + term_h
                acc = acc + bdf
                acc_head = acc_head + bdf

                # Lane-dense main store; aligned 128-wide fix-up store for the head.
                o_ref[b] = post_pointwise(acc).astype(out_dtype)
                o_ref[b, :, 0:_HL] = post_pointwise(acc_head).astype(out_dtype)
                # Carry this tile's tail as the next tile's halo (aligned slice).
                halo_ref[b] = h[:, TL_in - _HL:]
            else:
                # Single-L-tile path: left zero pad handled with zero-filled shifts.
                acc = None
                for k in range(K):
                    s = pad - k
                    if s == 0:
                        tap = h
                    elif s > 0:
                        tap = jnp.where(lane_full >= s,
                                        pltpu.roll(h, shift=s, axis=1), 0.0)
                    else:
                        # left shift; wrapped lanes land at >= TL_out and are sliced off
                        tap = pltpu.roll(h, shift=s % TL_in, axis=1)
                    term = tap * wk_col[k]
                    acc = term if acc is None else acc + term
                acc = acc + bdf
                o_ref[b] = post_pointwise(acc[:, :TL_out]).astype(out_dtype)

    return kernel


def separable_conv1d(x, w_pre, b_pre, w_dw, b_dw, w_post, b_post, kernel_size, padding):
    """Fused SeparableConv1D forward (PyTorch semantics, NCW layout).

    x:      (B, C_in, L)
    w_pre:  (C_inner, C_in, 1),  b_pre:  (C_inner,)
    w_dw:   (C_inner, 1, K),     b_dw:   (C_inner,)
    w_post: (C_out, C_inner, 1), b_post: (C_out,)
    returns (B, C_out, L_out),   L_out = L + 2*padding - K + 1
    """
    B, C_in, L = x.shape
    C_inner = w_pre.shape[0]
    C_out = w_post.shape[0]
    K = int(kernel_size)
    pad = int(padding) * 2
    L_out = L + pad - K + 1
    assert L_out >= 1, "non-positive output length"

    w1 = w_pre.reshape(C_inner, C_in)
    b1 = b_pre.reshape(C_inner, 1)
    wd = w_dw.reshape(C_inner, K)
    bd = b_dw.reshape(C_inner, 1)
    w3 = w_post.reshape(C_out, C_inner)
    b3 = b_post.reshape(C_out, 1)

    # Tiny contractions stay off the MXU (VPU broadcast-FMA); larger ones use it.
    use_mxu_pre = C_in > 32
    use_mxu_post = C_inner > 32

    vmem_limit, budget = _vmem_budget()
    mode, Bt, TL_in, TL_out, n_b, n_l = _pick_tiles(
        B, C_in, C_inner, C_out, L, L_out, K, pad, x.dtype.itemsize, budget)
    carry = mode == "tiled"

    x_in = x
    if not carry and TL_in != L:
        # Right-pad L to a lane-aligned width.  The junk columns (== b_pre after the
        # pre-pointwise) provably never reach output columns < L_out.
        x_in = jnp.pad(x, ((0, 0), (0, 0), (0, TL_in - L)))

    kernel = _make_kernel(Bt=Bt, C_in=C_in, C_inner=C_inner, C_out=C_out, K=K, pad=pad,
                          TL_in=TL_in, TL_out=TL_out, carry=carry,
                          use_mxu_pre=use_mxu_pre, use_mxu_post=use_mxu_post)

    scratch_shapes = [pltpu.VMEM((Bt, C_inner, _HL), jnp.float32)] if carry else []

    return pl.pallas_call(
        kernel,
        out_shape=jax.ShapeDtypeStruct((B, C_out, L_out), x.dtype),
        grid_spec=pltpu.PrefetchScalarGridSpec(
            num_scalar_prefetch=0,
            grid=(n_b, n_l),
            in_specs=[
                pl.BlockSpec((Bt, C_in, TL_in), lambda nb, j: (nb, 0, j)),  # x (L on lanes)
                pl.BlockSpec((C_inner, C_in), lambda nb, j: (0, 0)),        # w_pre
                pl.BlockSpec((C_inner, 1), lambda nb, j: (0, 0)),           # b_pre
                pl.BlockSpec((C_inner, K), lambda nb, j: (0, 0)),           # w_dw
                pl.BlockSpec((C_inner, 1), lambda nb, j: (0, 0)),           # b_dw
                pl.BlockSpec((C_out, C_inner), lambda nb, j: (0, 0)),       # w_post
                pl.BlockSpec((C_out, 1), lambda nb, j: (0, 0)),             # b_post
            ],
            out_specs=pl.BlockSpec((Bt, C_out, TL_out), lambda nb, j: (nb, 0, j)),
            scratch_shapes=scratch_shapes,
        ),
        compiler_params=pltpu.CompilerParams(
            # Halo carry => L axis must stay sequential; batch is megacore-parallel.
            dimension_semantics=("parallel", "arbitrary"),
            vmem_limit_bytes=int(vmem_limit),
        ),
    )(x_in, w1, b1, wd, bd, w3, b3)


def separable_conv1d_reference(x, w_pre, b_pre, w_dw, b_dw, w_post, b_post,
                               kernel_size, padding):
    """Pure-JAX reference mirroring the PyTorch module, NCW layout throughout."""
    pad = padding * 2
    h = jnp.einsum('oci,bcl->bol', w_pre, x) + b_pre[None, :, None]
    h = jnp.pad(h, ((0, 0), (0, 0), (pad, 0)))
    L_out = h.shape[-1] - kernel_size + 1
    acc = jnp.zeros(h.shape[:2] + (L_out,), jnp.float32)
    for k in range(kernel_size):
        acc = acc + h[:, :, k:k + L_out] * w_dw[:, 0, k][None, :, None]
    acc = acc + b_dw[None, :, None]
    return jnp.einsum('odi,bdl->bol', w_post, acc) + b_post[None, :, None]


def _run_case(B, C_in, C_inner, C_out, L, K, padding):
    key = jax.random.PRNGKey(0)
    ks = jax.random.split(key, 7)
    x = jax.random.normal(ks[0], (B, C_in, L), jnp.float32)
    w_pre = jax.random.normal(ks[1], (C_inner, C_in, 1), jnp.float32) * 0.2
    b_pre = jax.random.normal(ks[2], (C_inner,), jnp.float32) * 0.1
    w_dw = jax.random.normal(ks[3], (C_inner, 1, K), jnp.float32) * 0.2
    b_dw = jax.random.normal(ks[4], (C_inner,), jnp.float32) * 0.1
    w_post = jax.random.normal(ks[5], (C_out, C_inner, 1), jnp.float32) * 0.2
    b_post = jax.random.normal(ks[6], (C_out,), jnp.float32) * 0.1

    out = separable_conv1d(x, w_pre, b_pre, w_dw, b_dw, w_post, b_post, K, padding)
    out = jax.block_until_ready(out)
    ref = separable_conv1d_reference(x, w_pre, b_pre, w_dw, b_dw, w_post, b_post,
                                     K, padding)
    L_out = L + 2 * padding - K + 1
    assert out.shape == (B, C_out, L_out), (out.shape, (B, C_out, L_out))
    err = float(jnp.max(jnp.abs(out - ref)))
    assert jnp.allclose(out, ref, atol=2e-3, rtol=2e-3), f"max abs err {err}"


if __name__ == "__main__":
    # Primary small case (short L): batch-folded single-step path, VPU pointwise.
    _run_case(B=2, C_in=4, C_inner=8, C_out=4, L=16, K=3, padding=1)
    # Longer sequence: tiled (B, nL) grid, roll-based depthwise with halo carry.
    _run_case(B=2, C_in=8, C_inner=16, C_out=8, L=512, K=3, padding=1)
    # pad != K-1 (L_out != L): generic single-tile path with a "negative"/left tap.
    _run_case(B=2, C_in=4, C_inner=8, C_out=4, L=16, K=4, padding=1)
    # Larger channel counts: MXU pointwise path + tiled grid with halo carry.
    _run_case(B=2, C_in=64, C_inner=96, C_out=48, L=256, K=3, padding=1)
    print("KERNEL_OK")
</pallas_src>

<mosaic_0001>
module attributes {stable_mosaic.version = 11 : i64} {
  func.func @kernel(%arg0: i32, %arg1: i32, %arg2: memref<2x4x128xf32, #tpu.memory_space<vmem>>, %arg3: memref<8x4xf32, #tpu.memory_space<vmem>>, %arg4: memref<8x1xf32, #tpu.memory_space<vmem>>, %arg5: memref<8x3xf32, #tpu.memory_space<vmem>>, %arg6: memref<8x1xf32, #tpu.memory_space<vmem>>, %arg7: memref<4x8xf32, #tpu.memory_space<vmem>>, %arg8: memref<4x1xf32, #tpu.memory_space<vmem>>, %arg9: memref<2x4x16xf32, #tpu.memory_space<vmem>>) attributes {dimension_semantics = [#tpu.dimension_semantics<parallel>, #tpu.dimension_semantics<arbitrary>], iteration_bounds = array<i64: 1, 1>, scalar_prefetch = 0 : i64, scratch_operands = 0 : i64, tpu.core_type = #tpu.core_type<tc>, window_params = [{transform_indices = @transform_0, window_bounds = array<i64: 2, 4, 128>}, {pipeline_mode = #tpu.pipeline_mode<synchronous>, transform_indices = @transform_1, window_bounds = array<i64: 8, 4>}, {pipeline_mode = #tpu.pipeline_mode<synchronous>, transform_indices = @transform_2, window_bounds = array<i64: 8, 1>}, {pipeline_mode = #tpu.pipeline_mode<synchronous>, transform_indices = @transform_3, window_bounds = array<i64: 8, 3>}, {pipeline_mode = #tpu.pipeline_mode<synchronous>, transform_indices = @transform_4, window_bounds = array<i64: 8, 1>}, {pipeline_mode = #tpu.pipeline_mode<synchronous>, transform_indices = @transform_5, window_bounds = array<i64: 4, 8>}, {pipeline_mode = #tpu.pipeline_mode<synchronous>, transform_indices = @transform_6, window_bounds = array<i64: 4, 1>}, {transform_indices = @transform_7, window_bounds = array<i64: 2, 4, 16>}]} {
    %c0 = arith.constant 0 : index
    %c0_0 = arith.constant 0 : index
    %0 = vector.load %arg4[%c0, %c0_0] : memref<8x1xf32, #tpu.memory_space<vmem>>, vector<8x1xf32>
    %c0_1 = arith.constant 0 : index
    %c0_2 = arith.constant 0 : index
    %1 = vector.load %arg6[%c0_1, %c0_2] : memref<8x1xf32, #tpu.memory_space<vmem>>, vector<8x1xf32>
    %c0_3 = arith.constant 0 : index
    %c0_4 = arith.constant 0 : index
    %2 = vector.load %arg8[%c0_3, %c0_4] : memref<4x1xf32, #tpu.memory_space<vmem>>, vector<4x1xf32>
    %c0_5 = arith.constant 0 : index
    %c0_6 = arith.constant 0 : index
    %3 = vector.load %arg5[%c0_5, %c0_6] : memref<8x3xf32, #tpu.memory_space<vmem>>, vector<8x1xf32>
    %c0_7 = arith.constant 0 : index
    %c1 = arith.constant 1 : index
    %4 = vector.load %arg5[%c0_7, %c1] : memref<8x3xf32, #tpu.memory_space<vmem>>, vector<8x1xf32>
    %c0_8 = arith.constant 0 : index
    %c2 = arith.constant 2 : index
    %5 = vector.load %arg5[%c0_8, %c2] : memref<8x3xf32, #tpu.memory_space<vmem>>, vector<8x1xf32>
    %c0_9 = arith.constant 0 : index
    %c0_10 = arith.constant 0 : index
    %6 = vector.load %arg3[%c0_9, %c0_10] : memref<8x4xf32, #tpu.memory_space<vmem>>, vector<8x1xf32>
    %c0_11 = arith.constant 0 : index
    %c1_12 = arith.constant 1 : index
    %7 = vector.load %arg3[%c0_11, %c1_12] : memref<8x4xf32, #tpu.memory_space<vmem>>, vector<8x1xf32>
    %c0_13 = arith.constant 0 : index
    %c2_14 = arith.constant 2 : index
    %8 = vector.load %arg3[%c0_13, %c2_14] : memref<8x4xf32, #tpu.memory_space<vmem>>, vector<8x1xf32>
    %c0_15 = arith.constant 0 : index
    %c3 = arith.constant 3 : index
    %9 = vector.load %arg3[%c0_15, %c3] : memref<8x4xf32, #tpu.memory_space<vmem>>, vector<8x1xf32>
    %c0_16 = arith.constant 0 : index
    %c0_17 = arith.constant 0 : index
    %10 = vector.load %arg7[%c0_16, %c0_17] : memref<4x8xf32, #tpu.memory_space<vmem>>, vector<4x1xf32>
    %c0_18 = arith.constant 0 : index
    %c1_19 = arith.constant 1 : index
    %11 = vector.load %arg7[%c0_18, %c1_19] : memref<4x8xf32, #tpu.memory_space<vmem>>, vector<4x1xf32>
    %c0_20 = arith.constant 0 : index
    %c2_21 = arith.constant 2 : index
    %12 = vector.load %arg7[%c0_20, %c2_21] : memref<4x8xf32, #tpu.memory_space<vmem>>, vector<4x1xf32>
    %c0_22 = arith.constant 0 : index
    %c3_23 = arith.constant 3 : index
    %13 = vector.load %arg7[%c0_22, %c3_23] : memref<4x8xf32, #tpu.memory_space<vmem>>, vector<4x1xf32>
    %c0_24 = arith.constant 0 : index
    %c4 = arith.constant 4 : index
    %14 = vector.load %arg7[%c0_24, %c4] : memref<4x8xf32, #tpu.memory_space<vmem>>, vector<4x1xf32>
    %c0_25 = arith.constant 0 : index
    %c5 = arith.constant 5 : index
    %15 = vector.load %arg7[%c0_25, %c5] : memref<4x8xf32, #tpu.memory_space<vmem>>, vector<4x1xf32>
    %c0_26 = arith.constant 0 : index
    %c6 = arith.constant 6 : index
    %16 = vector.load %arg7[%c0_26, %c6] : memref<4x8xf32, #tpu.memory_space<vmem>>, vector<4x1xf32>
    %c0_27 = arith.constant 0 : index
    %c7 = arith.constant 7 : index
    %17 = vector.load %arg7[%c0_27, %c7] : memref<4x8xf32, #tpu.memory_space<vmem>>, vector<4x1xf32>
    %18 = tpu.iota {dimensions = array<i32: 1>} : vector<8x128xi32>
    %c0_28 = arith.constant 0 : index
    %c0_29 = arith.constant 0 : index
    %c0_30 = arith.constant 0 : index
    %19 = vector.load %arg2[%c0_28, %c0_29, %c0_30] : memref<2x4x128xf32, #tpu.memory_space<vmem>>, vector<1x1x128xf32>
    %20 = vector.shape_cast %19 : vector<1x1x128xf32> to vector<1x128xf32>
    %c0_31 = arith.constant 0 : index
    %c1_32 = arith.constant 1 : index
    %c0_33 = arith.constant 0 : index
    %21 = vector.load %arg2[%c0_31, %c1_32, %c0_33] : memref<2x4x128xf32, #tpu.memory_space<vmem>>, vector<1x1x128xf32>
    %22 = vector.shape_cast %21 : vector<1x1x128xf32> to vector<1x128xf32>
    %c0_34 = arith.constant 0 : index
    %c2_35 = arith.constant 2 : index
    %c0_36 = arith.constant 0 : index
    %23 = vector.load %arg2[%c0_34, %c2_35, %c0_36] : memref<2x4x128xf32, #tpu.memory_space<vmem>>, vector<1x1x128xf32>
    %24 = vector.shape_cast %23 : vector<1x1x128xf32> to vector<1x128xf32>
    %c0_37 = arith.constant 0 : index
    %c3_38 = arith.constant 3 : index
    %c0_39 = arith.constant 0 : index
    %25 = vector.load %arg2[%c0_37, %c3_38, %c0_39] : memref<2x4x128xf32, #tpu.memory_space<vmem>>, vector<1x1x128xf32>
    %26 = vector.shape_cast %25 : vector<1x1x128xf32> to vector<1x128xf32>
    %27 = vector.broadcast %6 : vector<8x1xf32> to vector<8x128xf32>
    %28 = vector.broadcast %20 : vector<1x128xf32> to vector<8x128xf32>
    %29 = arith.mulf %27, %28 : vector<8x128xf32>
    %30 = vector.broadcast %7 : vector<8x1xf32> to vector<8x128xf32>
    %31 = vector.broadcast %22 : vector<1x128xf32> to vector<8x128xf32>
    %32 = arith.mulf %30, %31 : vector<8x128xf32>
    %33 = arith.addf %29, %32 : vector<8x128xf32>
    %34 = vector.broadcast %8 : vector<8x1xf32> to vector<8x128xf32>
    %35 = vector.broadcast %24 : vector<1x128xf32> to vector<8x128xf32>
    %36 = arith.mulf %34, %35 : vector<8x128xf32>
    %37 = arith.addf %33, %36 : vector<8x128xf32>
    %38 = vector.broadcast %9 : vector<8x1xf32> to vector<8x128xf32>
    %39 = vector.broadcast %26 : vector<1x128xf32> to vector<8x128xf32>
    %40 = arith.mulf %38, %39 : vector<8x128xf32>
    %41 = arith.addf %37, %40 : vector<8x128xf32>
    %42 = vector.broadcast %0 : vector<8x1xf32> to vector<8x128xf32>
    %43 = arith.addf %41, %42 : vector<8x128xf32>
    %c2_i32 = arith.constant 2 : i32
    %44 = vector.broadcast %c2_i32 : i32 to vector<8x128xi32>
    %45 = arith.cmpi sge, %18, %44 : vector<8x128xi32>
    %c2_i32_40 = arith.constant 2 : i32
    %46 = tpu.dynamic_rotate %43 by %c2_i32_40 dim 1 : vector<8x128xf32>, i32 -> vector<8x128xf32>
    %cst = arith.constant 0.000000e+00 : f32
    %47 = vector.broadcast %cst : f32 to vector<8x128xf32>
    %48 = arith.select %45, %46, %47 : vector<8x128xi1>, vector<8x128xf32>
    %49 = vector.broadcast %3 : vector<8x1xf32> to vector<8x128xf32>
    %50 = arith.mulf %48, %49 : vector<8x128xf32>
    %c1_i32 = arith.constant 1 : i32
    %51 = vector.broadcast %c1_i32 : i32 to vector<8x128xi32>
    %52 = arith.cmpi sge, %18, %51 : vector<8x128xi32>
    %c1_i32_41 = arith.constant 1 : i32
    %53 = tpu.dynamic_rotate %43 by %c1_i32_41 dim 1 : vector<8x128xf32>, i32 -> vector<8x128xf32>
    %cst_42 = arith.constant 0.000000e+00 : f32
    %54 = vector.broadcast %cst_42 : f32 to vector<8x128xf32>
    %55 = arith.select %52, %53, %54 : vector<8x128xi1>, vector<8x128xf32>
    %56 = vector.broadcast %4 : vector<8x1xf32> to vector<8x128xf32>
    %57 = arith.mulf %55, %56 : vector<8x128xf32>
    %58 = arith.addf %50, %57 : vector<8x128xf32>
    %59 = vector.broadcast %5 : vector<8x1xf32> to vector<8x128xf32>
    %60 = arith.mulf %43, %59 : vector<8x128xf32>
    %61 = arith.addf %58, %60 : vector<8x128xf32>
    %62 = vector.broadcast %1 : vector<8x1xf32> to vector<8x128xf32>
    %63 = arith.addf %61, %62 : vector<8x128xf32>
    %64 = vector.extract_strided_slice %63 {offsets = [0, 0], sizes = [8, 16], strides = [1, 1]} : vector<8x128xf32> to vector<8x16xf32>
    %65 = vector.extract_strided_slice %64 {offsets = [0, 0], sizes = [1, 16], strides = [1, 1]} : vector<8x16xf32> to vector<1x16xf32>
    %66 = vector.extract_strided_slice %64 {offsets = [1, 0], sizes = [1, 16], strides = [1, 1]} : vector<8x16xf32> to vector<1x16xf32>
    %67 = vector.extract_strided_slice %64 {offsets = [2, 0], sizes = [1, 16], strides = [1, 1]} : vector<8x16xf32> to vector<1x16xf32>
    %68 = vector.extract_strided_slice %64 {offsets = [3, 0], sizes = [1, 16], strides = [1, 1]} : vector<8x16xf32> to vector<1x16xf32>
    %69 = vector.extract_strided_slice %64 {offsets = [4, 0], sizes = [1, 16], strides = [1, 1]} : vector<8x16xf32> to vector<1x16xf32>
    %70 = vector.extract_strided_slice %64 {offsets = [5, 0], sizes = [1, 16], strides = [1, 1]} : vector<8x16xf32> to vector<1x16xf32>
    %71 = vector.extract_strided_slice %64 {offsets = [6, 0], sizes = [1, 16], strides = [1, 1]} : vector<8x16xf32> to vector<1x16xf32>
    %72 = vector.extract_strided_slice %64 {offsets = [7, 0], sizes = [1, 16], strides = [1, 1]} : vector<8x16xf32> to vector<1x16xf32>
    %73 = vector.broadcast %10 : vector<4x1xf32> to vector<4x16xf32>
    %74 = vector.broadcast %65 : vector<1x16xf32> to vector<4x16xf32>
    %75 = arith.mulf %73, %74 : vector<4x16xf32>
    %76 = vector.broadcast %11 : vector<4x1xf32> to vector<4x16xf32>
    %77 = vector.broadcast %66 : vector<1x16xf32> to vector<4x16xf32>
    %78 = arith.mulf %76, %77 : vector<4x16xf32>
    %79 = arith.addf %75, %78 : vector<4x16xf32>
    %80 = vector.broadcast %12 : vector<4x1xf32> to vector<4x16xf32>
    %81 = vector.broadcast %67 : vector<1x16xf32> to vector<4x16xf32>
    %82 = arith.mulf %80, %81 : vector<4x16xf32>
    %83 = arith.addf %79, %82 : vector<4x16xf32>
    %84 = vector.broadcast %13 : vector<4x1xf32> to vector<4x16xf32>
    %85 = vector.broadcast %68 : vector<1x16xf32> to vector<4x16xf32>
    %86 = arith.mulf %84, %85 : vector<4x16xf32>
    %87 = arith.addf %83, %86 : vector<4x16xf32>
    %88 = vector.broadcast %14 : vector<4x1xf32> to vector<4x16xf32>
    %89 = vector.broadcast %69 : vector<1x16xf32> to vector<4x16xf32>
    %90 = arith.mulf %88, %89 : vector<4x16xf32>
    %91 = arith.addf %87, %90 : vector<4x16xf32>
    %92 = vector.broadcast %15 : vector<4x1xf32> to vector<4x16xf32>
    %93 = vector.broadcast %70 : vector<1x16xf32> to vector<4x16xf32>
    %94 = arith.mulf %92, %93 : vector<4x16xf32>
    %95 = arith.addf %91, %94 : vector<4x16xf32>
    %96 = vector.broadcast %16 : vector<4x1xf32> to vector<4x16xf32>
    %97 = vector.broadcast %71 : vector<1x16xf32> to vector<4x16xf32>
    %98 = arith.mulf %96, %97 : vector<4x16xf32>
    %99 = arith.addf %95, %98 : vector<4x16xf32>
    %100 = vector.broadcast %17 : vector<4x1xf32> to vector<4x16xf32>
    %101 = vector.broadcast %72 : vector<1x16xf32> to vector<4x16xf32>
    %102 = arith.mulf %100, %101 : vector<4x16xf32>
    %103 = arith.addf %99, %102 : vector<4x16xf32>
    %104 = vector.broadcast %2 : vector<4x1xf32> to vector<4x16xf32>
    %105 = arith.addf %103, %104 : vector<4x16xf32>
    %c0_43 = arith.constant 0 : index
    %c0_44 = arith.constant 0 : index
    %c0_45 = arith.constant 0 : index
    %106 = vector.load %arg9[%c0_43, %c0_44, %c0_45] : memref<2x4x16xf32, #tpu.memory_space<vmem>>, vector<1x4x16xf32>
    %107 = vector.shape_cast %106 : vector<1x4x16xf32> to vector<4x16xf32>
    %108 = vector.shape_cast %105 : vector<4x16xf32> to vector<1x4x16xf32>
    tpu.vector_store %arg9[%c0_43, %c0_44, %c0_45], %108 {strides = array<i32>} : memref<2x4x16xf32, #tpu.memory_space<vmem>>, vector<1x4x16xf32>,
    %c1_46 = arith.constant 1 : index
    %c0_47 = arith.constant 0 : index
    %c0_48 = arith.constant 0 : index
    %109 = vector.load %arg2[%c1_46, %c0_47, %c0_48] : memref<2x4x128xf32, #tpu.memory_space<vmem>>, vector<1x1x128xf32>
    %110 = vector.shape_cast %109 : vector<1x1x128xf32> to vector<1x128xf32>
    %c1_49 = arith.constant 1 : index
    %c1_50 = arith.constant 1 : index
    %c0_51 = arith.constant 0 : index
    %111 = vector.load %arg2[%c1_49, %c1_50, %c0_51] : memref<2x4x128xf32, #tpu.memory_space<vmem>>, vector<1x1x128xf32>
    %112 = vector.shape_cast %111 : vector<1x1x128xf32> to vector<1x128xf32>
    %c1_52 = arith.constant 1 : index
    %c2_53 = arith.constant 2 : index
    %c0_54 = arith.constant 0 : index
    %113 = vector.load %arg2[%c1_52, %c2_53, %c0_54] : memref<2x4x128xf32, #tpu.memory_space<vmem>>, vector<1x1x128xf32>
    %114 = vector.shape_cast %113 : vector<1x1x128xf32> to vector<1x128xf32>
    %c1_55 = arith.constant 1 : index
    %c3_56 = arith.constant 3 : index
    %c0_57 = arith.constant 0 : index
    %115 = vector.load %arg2[%c1_55, %c3_56, %c0_57] : memref<2x4x128xf32, #tpu.memory_space<vmem>>, vector<1x1x128xf32>
    %116 = vector.shape_cast %115 : vector<1x1x128xf32> to vector<1x128xf32>
    %117 = vector.broadcast %6 : vector<8x1xf32> to vector<8x128xf32>
    %118 = vector.broadcast %110 : vector<1x128xf32> to vector<8x128xf32>
    %119 = arith.mulf %117, %118 : vector<8x128xf32>
    %120 = vector.broadcast %7 : vector<8x1xf32> to vector<8x128xf32>
    %121 = vector.broadcast %112 : vector<1x128xf32> to vector<8x128xf32>
    %122 = arith.mulf %120, %121 : vector<8x128xf32>
    %123 = arith.addf %119, %122 : vector<8x128xf32>
    %124 = vector.broadcast %8 : vector<8x1xf32> to vector<8x128xf32>
    %125 = vector.broadcast %114 : vector<1x128xf32> to vector<8x128xf32>
    %126 = arith.mulf %124, %125 : vector<8x128xf32>
    %127 = arith.addf %123, %126 : vector<8x128xf32>
    %128 = vector.broadcast %9 : vector<8x1xf32> to vector<8x128xf32>
    %129 = vector.broadcast %116 : vector<1x128xf32> to vector<8x128xf32>
    %130 = arith.mulf %128, %129 : vector<8x128xf32>
    %131 = arith.addf %127, %130 : vector<8x128xf32>
    %132 = vector.broadcast %0 : vector<8x1xf32> to vector<8x128xf32>
    %133 = arith.addf %131, %132 : vector<8x128xf32>
    %c2_i32_58 = arith.constant 2 : i32
    %134 = vector.broadcast %c2_i32_58 : i32 to vector<8x128xi32>
    %135 = arith.cmpi sge, %18, %134 : vector<8x128xi32>
    %c2_i32_59 = arith.constant 2 : i32
    %136 = tpu.dynamic_rotate %133 by %c2_i32_59 dim 1 : vector<8x128xf32>, i32 -> vector<8x128xf32>
    %cst_60 = arith.constant 0.000000e+00 : f32
    %137 = vector.broadcast %cst_60 : f32 to vector<8x128xf32>
    %138 = arith.select %135, %136, %137 : vector<8x128xi1>, vector<8x128xf32>
    %139 = vector.broadcast %3 : vector<8x1xf32> to vector<8x128xf32>
    %140 = arith.mulf %138, %139 : vector<8x128xf32>
    %c1_i32_61 = arith.constant 1 : i32
    %141 = vector.broadcast %c1_i32_61 : i32 to vector<8x128xi32>
    %142 = arith.cmpi sge, %18, %141 : vector<8x128xi32>
    %c1_i32_62 = arith.constant 1 : i32
    %143 = tpu.dynamic_rotate %133 by %c1_i32_62 dim 1 : vector<8x128xf32>, i32 -> vector<8x128xf32>
    %cst_63 = arith.constant 0.000000e+00 : f32
    %144 = vector.broadcast %cst_63 : f32 to vector<8x128xf32>
    %145 = arith.select %142, %143, %144 : vector<8x128xi1>, vector<8x128xf32>
    %146 = vector.broadcast %4 : vector<8x1xf32> to vector<8x128xf32>
    %147 = arith.mulf %145, %146 : vector<8x128xf32>
    %148 = arith.addf %140, %147 : vector<8x128xf32>
    %149 = vector.broadcast %5 : vector<8x1xf32> to vector<8x128xf32>
    %150 = arith.mulf %133, %149 : vector<8x128xf32>
    %151 = arith.addf %148, %150 : vector<8x128xf32>
    %152 = vector.broadcast %1 : vector<8x1xf32> to vector<8x128xf32>
    %153 = arith.addf %151, %152 : vector<8x128xf32>
    %154 = vector.extract_strided_slice %153 {offsets = [0, 0], sizes = [8, 16], strides = [1, 1]} : vector<8x128xf32> to vector<8x16xf32>
    %155 = vector.extract_strided_slice %154 {offsets = [0, 0], sizes = [1, 16], strides = [1, 1]} : vector<8x16xf32> to vector<1x16xf32>
    %156 = vector.extract_strided_slice %154 {offsets = [1, 0], sizes = [1, 16], strides = [1, 1]} : vector<8x16xf32> to vector<1x16xf32>
    %157 = vector.extract_strided_slice %154 {offsets = [2, 0], sizes = [1, 16], strides = [1, 1]} : vector<8x16xf32> to vector<1x16xf32>
    %158 = vector.extract_strided_slice %154 {offsets = [3, 0], sizes = [1, 16], strides = [1, 1]} : vector<8x16xf32> to vector<1x16xf32>
    %159 = vector.extract_strided_slice %154 {offsets = [4, 0], sizes = [1, 16], strides = [1, 1]} : vector<8x16xf32> to vector<1x16xf32>
    %160 = vector.extract_strided_slice %154 {offsets = [5, 0], sizes = [1, 16], strides = [1, 1]} : vector<8x16xf32> to vector<1x16xf32>
    %161 = vector.extract_strided_slice %154 {offsets = [6, 0], sizes = [1, 16], strides = [1, 1]} : vector<8x16xf32> to vector<1x16xf32>
    %162 = vector.extract_strided_slice %154 {offsets = [7, 0], sizes = [1, 16], strides = [1, 1]} : vector<8x16xf32> to vector<1x16xf32>
    %163 = vector.broadcast %10 : vector<4x1xf32> to vector<4x16xf32>
    %164 = vector.broadcast %155 : vector<1x16xf32> to vector<4x16xf32>
    %165 = arith.mulf %163, %164 : vector<4x16xf32>
    %166 = vector.broadcast %11 : vector<4x1xf32> to vector<4x16xf32>
    %167 = vector.broadcast %156 : vector<1x16xf32> to vector<4x16xf32>
    %168 = arith.mulf %166, %167 : vector<4x16xf32>
    %169 = arith.addf %165, %168 : vector<4x16xf32>
    %170 = vector.broadcast %12 : vector<4x1xf32> to vector<4x16xf32>
    %171 = vector.broadcast %157 : vector<1x16xf32> to vector<4x16xf32>
    %172 = arith.mulf %170, %171 : vector<4x16xf32>
    %173 = arith.addf %169, %172 : vector<4x16xf32>
    %174 = vector.broadcast %13 : vector<4x1xf32> to vector<4x16xf32>
    %175 = vector.broadcast %158 : vector<1x16xf32> to vector<4x16xf32>
    %176 = arith.mulf %174, %175 : vector<4x16xf32>
    %177 = arith.addf %173, %176 : vector<4x16xf32>
    %178 = vector.broadcast %14 : vector<4x1xf32> to vector<4x16xf32>
    %179 = vector.broadcast %159 : vector<1x16xf32> to vector<4x16xf32>
    %180 = arith.mulf %178, %179 : vector<4x16xf32>
    %181 = arith.addf %177, %180 : vector<4x16xf32>
    %182 = vector.broadcast %15 : vector<4x1xf32> to vector<4x16xf32>
    %183 = vector.broadcast %160 : vector<1x16xf32> to vector<4x16xf32>
    %184 = arith.mulf %182, %183 : vector<4x16xf32>
    %185 = arith.addf %181, %184 : vector<4x16xf32>
    %186 = vector.broadcast %16 : vector<4x1xf32> to vector<4x16xf32>
    %187 = vector.broadcast %161 : vector<1x16xf32> to vector<4x16xf32>
    %188 = arith.mulf %186, %187 : vector<4x16xf32>
    %189 = arith.addf %185, %188 : vector<4x16xf32>
    %190 = vector.broadcast %17 : vector<4x1xf32> to vector<4x16xf32>
    %191 = vector.broadcast %162 : vector<1x16xf32> to vector<4x16xf32>
    %192 = arith.mulf %190, %191 : vector<4x16xf32>
    %193 = arith.addf %189, %192 : vector<4x16xf32>
    %194 = vector.broadcast %2 : vector<4x1xf32> to vector<4x16xf32>
    %195 = arith.addf %193, %194 : vector<4x16xf32>
    %c1_64 = arith.constant 1 : index
    %c0_65 = arith.constant 0 : index
    %c0_66 = arith.constant 0 : index
    %196 = vector.load %arg9[%c1_64, %c0_65, %c0_66] : memref<2x4x16xf32, #tpu.memory_space<vmem>>, vector<1x4x16xf32>
    %197 = vector.shape_cast %196 : vector<1x4x16xf32> to vector<4x16xf32>
    %198 = vector.shape_cast %195 : vector<4x16xf32> to vector<1x4x16xf32>
    tpu.vector_store %arg9[%c1_64, %c0_65, %c0_66], %198 {strides = array<i32>} : memref<2x4x16xf32, #tpu.memory_space<vmem>>, vector<1x4x16xf32>,
    return
  }
  func.func @transform_0(%arg0: i32, %arg1: i32) -> (i32, i32, i32) {
    %c0_i32 = arith.constant 0 : i32
    %c0_i32_0 = arith.constant 0 : i32
    return %arg0, %c0_i32, %arg1 : i32, i32, i32
  }
  func.func @transform_1(%arg0: i32, %arg1: i32) -> (i32, i32) {
    %c0_i32 = arith.constant 0 : i32
    %c0_i32_0 = arith.constant 0 : i32
    %c0_i32_1 = arith.constant 0 : i32
    return %c0_i32, %c0_i32_0 : i32, i32
  }
  func.func @transform_2(%arg0: i32, %arg1: i32) -> (i32, i32) {
    %c0_i32 = arith.constant 0 : i32
    %c0_i32_0 = arith.constant 0 : i32
    %c0_i32_1 = arith.constant 0 : i32
    return %c0_i32, %c0_i32_0 : i32, i32
  }
  func.func @transform_3(%arg0: i32, %arg1: i32) -> (i32, i32) {
    %c0_i32 = arith.constant 0 : i32
    %c0_i32_0 = arith.constant 0 : i32
    %c0_i32_1 = arith.constant 0 : i32
    return %c0_i32, %c0_i32_0 : i32, i32
  }
  func.func @transform_4(%arg0: i32, %arg1: i32) -> (i32, i32) {
    %c0_i32 = arith.constant 0 : i32
    %c0_i32_0 = arith.constant 0 : i32
    %c0_i32_1 = arith.constant 0 : i32
    return %c0_i32, %c0_i32_0 : i32, i32
  }
  func.func @transform_5(%arg0: i32, %arg1: i32) -> (i32, i32) {
    %c0_i32 = arith.constant 0 : i32
    %c0_i32_0 = arith.constant 0 : i32
    %c0_i32_1 = arith.constant 0 : i32
    return %c0_i32, %c0_i32_0 : i32, i32
  }
  func.func @transform_6(%arg0: i32, %arg1: i32) -> (i32, i32) {
    %c0_i32 = arith.constant 0 : i32
    %c0_i32_0 = arith.constant 0 : i32
    %c0_i32_1 = arith.constant 0 : i32
    return %c0_i32, %c0_i32_0 : i32, i32
  }
  func.func @transform_7(%arg0: i32, %arg1: i32) -> (i32, i32, i32) {
    %c0_i32 = arith.constant 0 : i32
    %c0_i32_0 = arith.constant 0 : i32
    return %arg0, %c0_i32, %arg1 : i32, i32, i32
  }
}

</mosaic_0001>

<bundles_post_ra>
// kernel: tpu_custom_call.1
= control target key start
LH: loop header
LB: loop body
LE: loop exit
PB: predicated region body
PF: predicated region fallthrough
CT: control target
= control target key end

     0   :  { %v379_v1 = vmov 2   ;;  %v380_v2 = vmov 0   ;;  %s492_s0 = inlined_call_operand.vmem [shape: f32[2,4,128], index: 0, kind: input, shape index: {}]   ;;  %s493_s1 = inlined_call_operand.vmem [shape: f32[8,4], index: 1, kind: input, shape index: {}]   ;;  %s494_s2 = inlined_call_operand.vmem [shape: f32[8,1], index: 2, kind: input, shape index: {}]   ;;  %s495_s3 = inlined_call_operand.vmem [shape: f32[8,3], index: 3, kind: input, shape index: {}]   ;;  %s496_s4 = inlined_call_operand.vmem [shape: f32[8,1], index: 4, kind: input, shape index: {}]   ;;  %s497_s5 = inlined_call_operand.vmem [shape: f32[4,8], index: 5, kind: input, shape index: {}]   ;;  %s498_s6 = inlined_call_operand.vmem [shape: f32[4,1], index: 6, kind: input, shape index: {}]   ;;  %s499_s7 = inlined_call_operand.hbm [shape: f32[2,4,16], index: 7, kind: output, shape index: {}]  }
   0x1   :  { %v31_v0 = vld [vmem:[%s493_s1] sm:$0xff]  ;;  %339 = vset.pattern.permute.xlu1 %v379_v1  ;;  %337 = vset.pattern.permute.xlu0 %v380_v2 }
   0x2   :  { %60 = vperm.xlu1 %339, %v31_v0   ;;  %41 = vperm.xlu0 %337, %v31_v0  }
   0x3   :  { %12 = vsyncpa [#allocation3], 0  ;;  %v381_v3 = vmov 3   ;;  %v382_v4 = vmov 1   ;;  %v27_v5 = vld [vmem:[%s494_s2] sm:$0xff]  ;;  %s383_s22 = smov 1   ;;  %v33_v46 = vlaneseq }
   0x4   :  { %v30_v6 = vld [vmem:[%s495_s3] sm:$0xff]  ;;  %s384_s23 = smov 2   ;;  %v385_v38 = vmov 4   ;;  %v386_v39 = vmov 7   ;;  %v387_v40 = vmov 5   ;;  %v388_v41 = vmov 6  }
   0x5   :  { %v28_v7 = vld [vmem:[%s496_s4] sm:$0xff]  ;;  %v34_v49 = vand.u32 127, %v33_v46  ;;  %vm203_vm2 = vcmask 125952  }
   0x6   :  { %340 = vset.pattern.permute.xlu1 %v381_v3  ;;  %338 = vset.pattern.permute.xlu0 %v382_v4  ;;  %v32_v8 = vld [vmem:[%s497_s5] sm:$0xf]  ;;  %v320_v12 = vld [vmem:[%s492_s0 + $0x4] ss:$0 sm:$0xff]  ;;  %v321_v14 = vld [vmem:[%s492_s0 + $0x5] ss:$0 sm:$0xff] }
   0x7   :  { %70 = vperm.xlu1 %340, %v31_v0   ;;  %50 = vperm.xlu0 %338, %v31_v0   ;;  %v312_v11 = vld [vmem:[%s492_s0] ss:$0 sm:$0xff]  ;;  %v313_v13 = vld [vmem:[%s492_s0 + $0x1] ss:$0 sm:$0xff]  ;;  %v314_v15 = vld [vmem:[%s492_s0 + $0x2] ss:$0 sm:$0xff] }
   0x8   :  { %v322_v16 = vld [vmem:[%s492_s0 + $0x6] ss:$0 sm:$0xff]  ;;  %v315_v18 = vld [vmem:[%s492_s0 + $0x3] ss:$0 sm:$0xff]  ;;  %v323_v25 = vld [vmem:[%s492_s0 + $0x7] ss:$0 sm:$0xff] }
   0x9   :  { %v29_v42 = vld [vmem:[%s498_s6] sm:$0xf]  ;;  %vm85_vm0 = vcmp.ge.s32.totalorder %v34_v49, 2  ;;  %vm95_vm1 = vcmp.ge.s32.totalorder %v34_v49, 1  ;;  %s389_s6 = smov [#allocation2]  }
   0xa   :  { %s301_s25 = sshll.u32 %s389_s6, 4  ;;  %s302_s25 = int_to_ptr.vmem [resolvable:$true] %s301_s25 }
   0xb   :  { %341 = vset.pattern.permute.xlu1 %v380_v2  ;;  %342 = vset.pattern.permute.xlu0 %v380_v2  ;;  %s355_s26 = scalar_lea.vmem %s302_s25, 128  ;;  %p360_p1 = scmp.lt.s32.totalorder %s302_s25, %s302_s25 }
   0xc   :  { %81 = vperm.xlu1 %341, %v27_v5   ;;  %91 = vperm.xlu0 %342, %v30_v6   ;;  %p356_p0 = scmp.ne.s32.totalorder %s302_s25, %s355_s26  ;;  %p361_p2 = scmp.lt.s32.totalorder %s355_s26, %s355_s26 }
   0xe   :  { %p362_p3 = por %p361_p2, %p360_p1 }
  0x10   :  { %343 = vset.pattern.permute.xlu1 %v382_v4  ;;  %113 = vperm.xlu0 %342, %v28_v7   ;;  %p363_p4 = pnand %p362_p3, %p356_p0 }
  0x11   :  { %100 = vperm.xlu1 %343, %v30_v6  }
  0x14   :  { %346 = vset.pattern.permute.xlu0 %v382_v4 }
  0x15   :  { %344 = vset.pattern.permute.xlu1 %v379_v1 }
  0x16   :  { %106 = vperm.xlu1 %344, %v30_v6  }
  0x1a   :  { %345 = vset.pattern.permute.xlu1 %v380_v2 }
  0x1b   :  { %119 = vperm.xlu1 %345, %v32_v8  }
  0x1f   :  { %347 = vset.pattern.permute.xlu1 %v379_v1 }
  0x81   :  { %v42_v9 = vpop.permute.xlu0 %41  ;;  %v61_v10 = vpop.permute.xlu1 %60 }
  0x82   :  { %v48_v20 = vmul.f32 %v312_v11, %v42_v9  ;;  %v214_v21 = vmul.f32 %v320_v12, %v42_v9  ;;  %v67_v24 = vmul.f32 %v314_v15, %v61_v10  ;;  %v225_v26 = vmul.f32 %v322_v16, %v61_v10 }
  0x86   :  { %v51_v17 = vpop.permute.xlu0 %50  ;;  %v71_v19 = vpop.permute.xlu1 %70 }
  0x87   :  { %v57_v22 = vmul.f32 %v313_v13, %v51_v17  ;;  %v219_v23 = vmul.f32 %v321_v14, %v51_v17  ;;  %v77_v29 = vmul.f32 %v315_v18, %v71_v19  ;;  %v231_v30 = vmul.f32 %v323_v25, %v71_v19 }
  0x89   :  { %v58_v27 = vadd.f32 %v57_v22, %v48_v20  ;;  %v220_v28 = vadd.f32 %v219_v23, %v214_v21 }
  0x8b   :  { %v68_v31 = vadd.f32 %v67_v24, %v58_v27  ;;  %v226_v32 = vadd.f32 %v225_v26, %v220_v28  ;;  %v82_v33 = vpop.permute.xlu1 %81  ;;  %v92_v44 = vpop.permute.xlu0 %91 }
  0x8d   :  { %v78_v34 = vadd.f32 %v77_v29, %v68_v31  ;;  %v232_v35 = vadd.f32 %v231_v30, %v226_v32 }
  0x8f   :  { %v84_v36 = vadd.f32 %v82_v33, %v78_v34  ;;  %v233_v37 = vadd.f32 %v232_v35, %v82_v33  ;;  %v114_v47 = vpop.permute.xlu0 %113 }
  0x90   :  { %v101_v43 = vpop.permute.xlu1 %100 }
  0x91   :  { %96 = vrot.lane.b32.xlu1 %v84_v36, %s383_s22  ;;  %86 = vrot.lane.b32.xlu0 %v84_v36, %s384_s23 }
  0x95   :  { %238 = vrot.lane.b32.xlu0 %v233_v37, %s383_s22  ;;  %234 = vrot.lane.b32.xlu1 %v233_v37, %s384_s23  ;;  %v107_v45 = vpop.permute.xlu1 %106 }
  0x96   :  { %v109_v63 = vmul.f32 %v107_v45, %v84_v36  ;;  %v243_v0 = vmul.f32 %v233_v37, %v107_v45 }
  0x99   :  { %128 = vperm.xlu0 %346, %v32_v8   ;;  %138 = vperm.xlu1 %347, %v32_v8  }
  0x9a   :  { %v120_v48 = vpop.permute.xlu1 %119 }
  0x9d   :  { %349 = vset.pattern.permute.xlu0 %v385_v38  ;;  %348 = vset.pattern.permute.xlu1 %v381_v3 }
  0x9e   :  { %158 = vperm.xlu0 %349, %v32_v8   ;;  %148 = vperm.xlu1 %348, %v32_v8  }
  0xa2   :  { %352 = vset.pattern.permute.xlu0 %v386_v39  ;;  %350 = vset.pattern.permute.xlu1 %v387_v40 }
  0xa3   :  { %188 = vperm.xlu0 %352, %v32_v8   ;;  %168 = vperm.xlu1 %350, %v32_v8  }
  0xa7   :  { %351 = vset.pattern.permute.xlu1 %v388_v41  ;;  %354 = vset.pattern.permute.xlu0 %v380_v2 }
  0xa8   :  { %178 = vperm.xlu1 %351, %v32_v8  }
  0xac   :  { %353 = vset.pattern.permute.xlu1 %v380_v2  ;;  %v123_v2 = vshrl.u32 %v33_v46, 7 }
  0xad   :  { %199 = vperm.xlu1 %353, %v29_v42  }
  0xae   :  { %v124_v6 = vsub.s32 0, %v123_v2  ;;  %v133_v8 = vsub.s32 1, %v123_v2  ;;  %v143_v10 = vsub.s32 2, %v123_v2  ;;  %v153_v18 = vsub.s32 3, %v123_v2 }
  0xaf   :  { %v163_v27 = vsub.s32 4, %v123_v2  ;;  %v173_v35 = vsub.s32 5, %v123_v2  ;;  %v183_v41 = vsub.s32 6, %v123_v2 }
 0x103   :  { %v87_v50 = vpop.permute.xlu0 %86  ;;  %v97_v51 = vpop.permute.xlu1 %96 }
 0x104   :  { %v88_v52 = vsel %vm85_vm0, %v87_v50, 0.0  ;;  %v98_v53 = vsel %vm95_vm1, %v97_v51, 0.0 }
 0x105   :  { %v94_v54 = vmul.f32 %v92_v44, %v88_v52  ;;  %v103_v55 = vmul.f32 %v101_v43, %v98_v53 }
 0x107   :  { %v239_v56 = vpop.permute.xlu0 %238  ;;  %v235_v57 = vpop.permute.xlu1 %234  ;;  %v104_v58 = vadd.f32 %v103_v55, %v94_v54 }
 0x108   :  { %v240_v59 = vsel %vm95_vm1, %v239_v56, 0.0  ;;  %v236_v60 = vsel %vm85_vm0, %v235_v57, 0.0 }
 0x109   :  { %v241_v61 = vmul.f32 %v240_v59, %v101_v43  ;;  %v237_v62 = vmul.f32 %v236_v60, %v92_v44  ;;  %v110_v3 = vadd.f32 %v109_v63, %v104_v58 }
 0x10b   :  { %v242_v1 = vadd.f32 %v241_v61, %v237_v62  ;;  %v116_v5 = vadd.f32 %v114_v47, %v110_v3 }
 0x10d   :  { %v244_v4 = vadd.f32 %v243_v0, %v242_v1  ;;  %v125_v9 = vrot.slane %v116_v5, %v124_v6  ;;  %v134_v12 = vrot.slane %v116_v5, %v133_v8  ;;  %v144_v16 = vrot.slane %v116_v5, %v143_v10 }
 0x10e   :  { %v154_v28 = vrot.slane %v116_v5, %v153_v18  ;;  %v164_v37 = vrot.slane %v116_v5, %v163_v27  ;;  %v174_v44 = vrot.slane %v116_v5, %v173_v35  ;;  %v184_v52 = vrot.slane %v116_v5, %v183_v41 }
 0x10f   :  { %v245_v7 = vadd.f32 %v244_v4, %v114_v47  ;;  %v126_v15 = vmul.f32 %v125_v9, %v120_v48  ;;  %v193_v47 = vsub.s32 7, %v123_v2 }
 0x111   :  { %v249_v11 = vrot.slane %v245_v7, %v124_v6  ;;  %v254_v13 = vrot.slane %v245_v7, %v133_v8  ;;  %v260_v22 = vrot.slane %v245_v7, %v143_v10  ;;  %v266_v29 = vrot.slane %v245_v7, %v153_v18 }
 0x112   :  { %v272_v38 = vrot.slane %v245_v7, %v163_v27  ;;  %v278_v45 = vrot.slane %v245_v7, %v173_v35  ;;  %v284_v53 = vrot.slane %v245_v7, %v183_v41  ;;  %v194_v55 = vrot.slane %v116_v5, %v193_v47 }
 0x113   :  { %v250_v20 = vmul.f32 %v249_v11, %v120_v48  ;;  %v290_v56 = vrot.slane %v245_v7, %v193_v47 }
 0x118   :  { %v129_v14 = vpop.permute.xlu0 %128  ;;  %v139_v17 = vpop.permute.xlu1 %138 }
 0x119   :  { %v135_v19 = vmul.f32 %v134_v12, %v129_v14  ;;  %v255_v21 = vmul.f32 %v254_v13, %v129_v14  ;;  %v145_v25 = vmul.f32 %v144_v16, %v139_v17  ;;  %v261_v26 = vmul.f32 %v260_v22, %v139_v17 }
 0x11b   :  { %v136_v23 = vadd.f32 %v135_v19, %v126_v15  ;;  %v256_v24 = vadd.f32 %v255_v21, %v250_v20 }
 0x11d   :  { %v146_v30 = vadd.f32 %v145_v25, %v136_v23  ;;  %v262_v31 = vadd.f32 %v261_v26, %v256_v24  ;;  %v149_v32 = vpop.permute.xlu1 %148  ;;  %v159_v36 = vpop.permute.xlu0 %158 }
 0x11e   :  { %v155_v33 = vmul.f32 %v154_v28, %v149_v32  ;;  %v267_v34 = vmul.f32 %v266_v29, %v149_v32  ;;  %v165_v42 = vmul.f32 %v164_v37, %v159_v36  ;;  %v273_v43 = vmul.f32 %v272_v38, %v159_v36 }
 0x120   :  { %v156_v39 = vadd.f32 %v155_v33, %v146_v30  ;;  %v268_v40 = vadd.f32 %v267_v34, %v262_v31 }
 0x122   :  { %v169_v46 = vpop.permute.xlu1 %168  ;;  %v166_v48 = vadd.f32 %v165_v42, %v156_v39  ;;  %v274_v49 = vadd.f32 %v273_v43, %v268_v40  ;;  %v189_v54 = vpop.permute.xlu0 %188 }
 0x123   :  { %v175_v50 = vmul.f32 %v174_v44, %v169_v46  ;;  %v279_v51 = vmul.f32 %v278_v45, %v169_v46  ;;  %v195_v62 = vmul.f32 %v194_v55, %v189_v54  ;;  %v291_v63 = vmul.f32 %v290_v56, %v189_v54 }
 0x125   :  { %v176_v58 = vadd.f32 %v175_v50, %v166_v48  ;;  %v280_v59 = vadd.f32 %v279_v51, %v274_v49 }
 0x127   :  { %v179_v57 = vpop.permute.xlu1 %178 }
 0x128   :  { %v185_v60 = vmul.f32 %v184_v52, %v179_v57  ;;  %v285_v61 = vmul.f32 %v284_v53, %v179_v57 }
 0x12a   :  { %v186_v0 = vadd.f32 %v185_v60, %v176_v58  ;;  %v286_v1 = vadd.f32 %v285_v61, %v280_v59 }
 0x12c   :  { %v196_v2 = vadd.f32 %v195_v62, %v186_v0  ;;  %v292_v3 = vadd.f32 %v291_v63, %v286_v1  ;;  %v200_v4 = vpop.permute.xlu1 %199 }
 0x12e   :  { %v202_v6 = vadd.f32 %v200_v4, %v196_v2  ;;  %v293_v8 = vadd.f32 %v292_v3, %v200_v4 }
 0x130   :  { %204 = vst.msk [vmem:[#allocation2] sm:$0xf] %vm203_vm2, %v202_v6  ;;  %295 = vst.msk [vmem:[#allocation2 + $0x4] sm:$0xf] %vm203_vm2, %v293_v8 }
 0x131   :  { %366 = shalt.err (!%p363_p4)
}
 0x132   :  { %s367_s28 = scalar_lea.hbm %s499_s7, 128 }
 0x133   :  { %p368_p5 = scmp.ne.s32.totalorder %s499_s7, %s367_s28  ;;  %p371_p6 = scmp.lt.u32.totalorder %s367_s28, %s499_s7 }
 0x135   :  { %p373_p7 = pnand %p371_p6, %p368_p5 }
 0x137   :  { %376 = shalt.err (!%p373_p7)
}
 0x138   :  { %s390_s3 = smov 64   ;;  %s391_s9 = smov 4  }
 0x139   :  { %307 = dma.vmem_to_hbm [thread:$0]  %s302_s25, 128, %s499_s7, [#allocation3], %s390_s3, %s390_s3, %s391_s9  }
 0x13a   :  { %377 = dma.done.wait [#allocation3], 128  }
 0x13b   :  { %378 = vsyncadd [#allocation3], 4294967168 }
 0x13c   :  { %311 = vsyncpa [#allocation3], 1 }

</bundles_post_ra>
